<compile_context>
chip_gen: v7x
topology: tpu7x:2x2x1
jax: 0.10.0
libtpu: 0.0.40
codegen_flags: <defaults>
</compile_context>

<pallas_src>
import functools
import math

import jax
import jax.numpy as jnp
from jax.experimental import pallas as pl
from jax.experimental.pallas import tpu as pltpu

N = 10
IN_F = 2 * N      # 20
HID_F = 4 * N     # 40
OUT_F = 1
EPS = 1e-12
LOG_EPS = math.log(EPS)
TINY = 1e-30      # keeps log() finite when cos <= 0; result is floored at LOG_EPS anyway


def punn2_kernel(x_ref, w1_ref, w2_ref, oT_ref):
    # Natural (TB, IN_F) row-block; transpose on the (idle) XLU so all transcendentals
    # below run lane-dense with batch on the 128-lane axis.
    xT = jnp.transpose(x_ref[...]).astype(jnp.float32)                    # (IN_F, TB)

    # ---- Layer 1: SmoothPUNN(2n -> 4n), complex-log product units -----------
    log_mag = jnp.log(jnp.abs(xT) + EPS)                                  # Re(log x)
    theta = jnp.where(xT < 0.0, jnp.float32(jnp.pi), jnp.float32(0.0))    # Im(log x)

    # Two small MXU calls (weights are 3 vregs); no concat/slice copies.
    z_re = jnp.dot(w1_ref[...], log_mag, preferred_element_type=jnp.float32)  # (HID_F, TB)
    z_im = jnp.dot(w1_ref[...], theta, preferred_element_type=jnp.float32)    # (HID_F, TB)

    # ---- OReLU + layer-2 input log, fused (no exp materialization) ----------
    #   h     = max(exp(z_re) * cos(z_im), 0)
    #   log_h = log(h + EPS)  ~=  max(z_re + log(max(cos, 0)), log(EPS))
    # (exact except when h <~ EPS = 1e-12, where both hit the EPS floor).
    cos_zi = jnp.cos(z_im)
    log_h = jnp.maximum(z_re + jnp.log(jnp.maximum(cos_zi, 0.0) + TINY), LOG_EPS)

    # ---- Layer 2: SmoothPUNN(4n -> 1) ----------------------------------------
    # h >= 0 after OReLU  =>  Im(log h) == 0  =>  cos(Im z2) == 1 exactly: real path only.
    z2 = jnp.dot(w2_ref[...], log_h, preferred_element_type=jnp.float32)       # (OUT_F, TB)
    oT_ref[...] = jnp.exp(z2).astype(oT_ref.dtype)


def _round_up(v, m):
    return (v + m - 1) // m * m


@functools.partial(jax.jit, static_argnames=("tb",))
def punn2_forward(x, w1, w2, *, tb=8192):
    """x: (B, 2n) f32; w1: (4n, 2n); w2: (1, 4n)  ->  (B, 1) f32."""
    B = x.shape[0]

    if B <= 256:
        # Single exact block: block dims equal the full array dims, no OOB lanes.
        tb_eff = B
    else:
        # Multiple of 128 (lane-dense stores) and at least 2 grid steps so the
        # "parallel" batch axis can be sharded across both v7x TensorCores.
        half = _round_up(_round_up(B, 128) // 2, 128)
        tb_eff = max(128, min(tb, half))
    grid = pl.cdiv(B, tb_eff)

    cost = pl.CostEstimate(
        flops=2 * B * (2 * IN_F * HID_F + HID_F * OUT_F),
        transcendentals=B * (IN_F + 2 * HID_F + OUT_F),
        bytes_accessed=4 * (B * (IN_F + OUT_F) + HID_F * IN_F + OUT_F * HID_F),
    )

    outT = pl.pallas_call(
        punn2_kernel,
        out_shape=jax.ShapeDtypeStruct((OUT_F, B), jnp.float32),
        grid=(grid,),
        in_specs=[
            pl.BlockSpec((tb_eff, IN_F), lambda i: (i, 0)),   # contiguous row-block of x
            pl.BlockSpec((HID_F, IN_F), lambda i: (0, 0)),    # tiny weights: resident
            pl.BlockSpec((OUT_F, HID_F), lambda i: (0, 0)),
        ],
        out_specs=pl.BlockSpec((OUT_F, tb_eff), lambda i: (0, i)),  # lane-dense store
        compiler_params=pltpu.CompilerParams(
            dimension_semantics=("parallel",),        # megacore-shards batch on v7x
            vmem_limit_bytes=32 * 1024 * 1024,        # covers tb=8192 on v5e's 16 MiB default
        ),
        cost_estimate=cost,
    )(x, w1, w2)

    # (1, B) -> (B, 1): pure reshape of contiguous memory, no data movement.
    return jnp.reshape(outT, (B, OUT_F))


def punn2_reference(x, w1, w2):
    """Pure-JAX reference with the full, unfused complex path in both layers."""
    def layer(a, w):
        lm = jnp.log(jnp.abs(a) + EPS)
        th = jnp.where(a < 0, jnp.pi, 0.0)
        return jnp.exp(lm @ w.T) * jnp.cos(th @ w.T)

    h = layer(x, w1)
    h = jnp.maximum(h, 0.0)
    return layer(h, w2)


if __name__ == "__main__":
    key = jax.random.PRNGKey(0)
    k_x, k_w1, k_w2 = jax.random.split(key, 3)

    B = 8
    x = jax.random.normal(k_x, (B, IN_F), dtype=jnp.float32)
    # Small weights keep exp() well-conditioned (deterministic "checkpoint").
    w1 = 0.1 * jax.random.normal(k_w1, (HID_F, IN_F), dtype=jnp.float32)
    w2 = 0.1 * jax.random.normal(k_w2, (OUT_F, HID_F), dtype=jnp.float32)

    out = jax.block_until_ready(punn2_forward(x, w1, w2))

    ref = punn2_reference(x, w1, w2)
    assert out.shape == (B, OUT_F)
    assert jnp.allclose(out, ref, rtol=1e-4, atol=1e-5), "mismatch vs reference"

    print("KERNEL_OK")
</pallas_src>

<mosaic_0001>
module attributes {stable_mosaic.version = 11 : i64} {
  func.func @punn2_kernel(%arg0: i32, %arg1: memref<8x20xf32, #tpu.memory_space<vmem>>, %arg2: memref<40x20xf32, #tpu.memory_space<vmem>>, %arg3: memref<1x40xf32, #tpu.memory_space<vmem>>, %arg4: memref<1x8xf32, #tpu.memory_space<vmem>>) attributes {dimension_semantics = [#tpu.dimension_semantics<parallel>], iteration_bounds = array<i64: 1>, scalar_prefetch = 0 : i64, scratch_operands = 0 : i64, tpu.core_type = #tpu.core_type<tc>, window_params = [{transform_indices = @transform_0, window_bounds = array<i64: 8, 20>}, {pipeline_mode = #tpu.pipeline_mode<synchronous>, transform_indices = @transform_1, window_bounds = array<i64: 40, 20>}, {pipeline_mode = #tpu.pipeline_mode<synchronous>, transform_indices = @transform_2, window_bounds = array<i64: 1, 40>}, {transform_indices = @transform_3, window_bounds = array<i64: 1, 8>}]} {
    %c0 = arith.constant 0 : index
    %c0_0 = arith.constant 0 : index
    %0 = vector.load %arg1[%c0, %c0_0] : memref<8x20xf32, #tpu.memory_space<vmem>>, vector<8x20xf32>
    %1 = tpu.transpose %0, [1, 0] : vector<8x20xf32> -> vector<20x8xf32>
    %2 = math.absf %1 : vector<20x8xf32>
    %cst = arith.constant 9.99999996E-13 : f32
    %3 = vector.broadcast %cst : f32 to vector<20x8xf32>
    %4 = arith.addf %2, %3 : vector<20x8xf32>
    %5 = math.log %4 : vector<20x8xf32>
    %cst_1 = arith.constant 0.000000e+00 : f32
    %6 = vector.broadcast %cst_1 : f32 to vector<20x8xf32>
    %7 = arith.cmpf olt, %1, %6 : vector<20x8xf32>
    %cst_2 = arith.constant 3.14159274 : f32
    %cst_3 = arith.constant 0.000000e+00 : f32
    %8 = vector.broadcast %cst_2 : f32 to vector<20x8xf32>
    %9 = vector.broadcast %cst_3 : f32 to vector<20x8xf32>
    %10 = arith.select %7, %8, %9 : vector<20x8xi1>, vector<20x8xf32>
    %c0_4 = arith.constant 0 : index
    %c0_5 = arith.constant 0 : index
    %11 = vector.load %arg2[%c0_4, %c0_5] : memref<40x20xf32, #tpu.memory_space<vmem>>, vector<40x20xf32>
    %cst_6 = arith.constant dense<0.000000e+00> : vector<40x8xf32>
    %12 = tpu.matmul %11, %5, %cst_6 {dimension_numbers = #tpu.dot_dimension_numbers<[1], [0], [0], [1], [0, 0, 1, 1], [], []>} : vector<40x20xf32>, vector<20x8xf32>, vector<40x8xf32> -> vector<40x8xf32>
    %c0_7 = arith.constant 0 : index
    %c0_8 = arith.constant 0 : index
    %13 = vector.load %arg2[%c0_7, %c0_8] : memref<40x20xf32, #tpu.memory_space<vmem>>, vector<40x20xf32>
    %cst_9 = arith.constant dense<0.000000e+00> : vector<40x8xf32>
    %14 = tpu.matmul %13, %10, %cst_9 {dimension_numbers = #tpu.dot_dimension_numbers<[1], [0], [0], [1], [0, 0, 1, 1], [], []>} : vector<40x20xf32>, vector<20x8xf32>, vector<40x8xf32> -> vector<40x8xf32>
    %15 = math.cos %14 : vector<40x8xf32>
    %cst_10 = arith.constant 0.000000e+00 : f32
    %16 = vector.broadcast %cst_10 : f32 to vector<40x8xf32>
    %17 = arith.maximumf %15, %16 : vector<40x8xf32>
    %cst_11 = arith.constant 1.000000e-30 : f32
    %18 = vector.broadcast %cst_11 : f32 to vector<40x8xf32>
    %19 = arith.addf %17, %18 : vector<40x8xf32>
    %20 = math.log %19 : vector<40x8xf32>
    %21 = arith.addf %12, %20 : vector<40x8xf32>
    %cst_12 = arith.constant -27.6310215 : f32
    %22 = vector.broadcast %cst_12 : f32 to vector<40x8xf32>
    %23 = arith.maximumf %21, %22 : vector<40x8xf32>
    %c0_13 = arith.constant 0 : index
    %c0_14 = arith.constant 0 : index
    %24 = vector.load %arg3[%c0_13, %c0_14] : memref<1x40xf32, #tpu.memory_space<vmem>>, vector<1x40xf32>
    %cst_15 = arith.constant dense<0.000000e+00> : vector<1x8xf32>
    %25 = tpu.matmul %24, %23, %cst_15 {dimension_numbers = #tpu.dot_dimension_numbers<[1], [0], [0], [1], [0, 0, 1, 1], [], []>} : vector<1x40xf32>, vector<40x8xf32>, vector<1x8xf32> -> vector<1x8xf32>
    %26 = math.exp %25 : vector<1x8xf32>
    %c0_16 = arith.constant 0 : index
    %c0_17 = arith.constant 0 : index
    %27 = vector.load %arg4[%c0_16, %c0_17] : memref<1x8xf32, #tpu.memory_space<vmem>>, vector<1x8xf32>
    tpu.vector_store %arg4[%c0_16, %c0_17], %26 {strides = array<i32>} : memref<1x8xf32, #tpu.memory_space<vmem>>, vector<1x8xf32>,
    return
  }
  func.func @transform_0(%arg0: i32) -> (i32, i32) {
    %c0_i32 = arith.constant 0 : i32
    %c0_i32_0 = arith.constant 0 : i32
    return %arg0, %c0_i32 : i32, i32
  }
  func.func @transform_1(%arg0: i32) -> (i32, i32) {
    %c0_i32 = arith.constant 0 : i32
    %c0_i32_0 = arith.constant 0 : i32
    %c0_i32_1 = arith.constant 0 : i32
    return %c0_i32, %c0_i32_0 : i32, i32
  }
  func.func @transform_2(%arg0: i32) -> (i32, i32) {
    %c0_i32 = arith.constant 0 : i32
    %c0_i32_0 = arith.constant 0 : i32
    %c0_i32_1 = arith.constant 0 : i32
    return %c0_i32, %c0_i32_0 : i32, i32
  }
  func.func @transform_3(%arg0: i32) -> (i32, i32) {
    %c0_i32 = arith.constant 0 : i32
    %c0_i32_0 = arith.constant 0 : i32
    return %c0_i32, %arg0 : i32, i32
  }
}

</mosaic_0001>

<bundles_post_ra>
// kernel: punn2_forward.1
= control target key start
LH: loop header
LB: loop body
LE: loop exit
PB: predicated region body
PF: predicated region fallthrough
CT: control target
= control target key end

     0   :  { %s1662_s0 = inlined_call_operand.vmem [shape: f32[8,20], index: 0, kind: input, shape index: {}]   ;;  %s1663_s1 = inlined_call_operand.vmem [shape: f32[40,20], index: 1, kind: input, shape index: {}]   ;;  %s1664_s2 = inlined_call_operand.vmem [shape: f32[1,40], index: 2, kind: input, shape index: {}]   ;;  %s1665_s3 = inlined_call_operand.hbm [shape: f32[1,8], index: 3, kind: output, shape index: {}]  }
   0x1   :  { %v15_v0 = vld [vmem:[%s1662_s0] sm:$0xff] }
   0x2   :  { %8 = vsyncpa [#allocation3], 0  ;;  %16 = vxpose.xlu0.b32.start.end [1/1] (short) (narrow) %v15_v0, 24  ;;  %v1124_v1 = vmov 0.0|0.0   ;;  %vm1125_vm0 = vmmov 0   ;;  %v1126_v2 = vmov 0.0  }
   0x3   :  { %1019 = vmatprep.subr.bf16.mxu0 %v1124_v1  ;;  %1022 = vmatprep.subr.bf16.mxu1 %v1124_v1  ;;  %v1127_v9 = vmov 3.140625|3.140625   ;;  %vm87_vm4 = vcmask 1043456   ;;  %v66_v12 = vld [vmem:[%s1663_s1] sm:$0xff]  ;;  %vm71_vm6 = vcmask 162816   ;;  %v67_v15 = vld [vmem:[%s1663_s1 + $0x8] sm:$0xff] }
   0x4   :  { %970 = vmatprep.mubr.msk.f32.mxu0 %vm1125_vm0, %v1126_v2  ;;  %991 = vmatprep.mubr.msk.f32.mxu1 %vm1125_vm0, %v1126_v2  ;;  %v68_v17 = vld [vmem:[%s1663_s1 + $0x10] sm:$0xff]  ;;  %v69_v21 = vld [vmem:[%s1663_s1 + $0x18] sm:$0xff]  ;;  %v70_v24 = vld [vmem:[%s1663_s1 + $0x20] sm:$0xff]  ;;  %v1128_v54 = vmov 683565275   ;;  %s1134_s24 = smov [#allocation2]  }
   0x5   :  { %v1129_v56 = vmov 2475754826   ;;  %v1130_v60 = vmov 2131351028   ;;  %v1131_v62 = vmov 2102212464  }
   0x6   :  { %v1132_v0 = vmov 920167782   ;;  %s899_s25 = sshll.u32 %s1134_s24, 4  ;;  %s900_s25 = int_to_ptr.vmem [resolvable:$true] %s899_s25 }
   0x7   :  { %s1100_s26 = scalar_lea.vmem %s900_s25, 16  ;;  %s1104_s27 = scalar_lea.vmem %s900_s25, 32 }
   0x8   :  { %p1101_p0 = scmp.ne.s32.totalorder %s900_s25, %s1100_s26  ;;  %p1105_p1 = scmp.lt.s32.totalorder %s900_s25, %s900_s25 }
   0x9   :  { %p1106_p2 = scmp.lt.s32.totalorder %s1104_s27, %s1100_s26 }
   0xb   :  { %p1107_p3 = por %p1106_p2, %p1105_p1 }
   0xd   :  { %p1108_p4 = pnand %p1107_p3, %p1101_p0 }
  0x82   :  { %v32_v3 = vpop.trf.xlu0 }
  0x83   :  { %v48_v4 = vand.u32 2147483647, %v32_v3  ;;  %vm60_vm1 = vcmp.lt.f32.partialorder %v32_v3, 0.0 }
  0x85   :  { %v51_v5 = vadd.f32 1e-12, %v48_v4 }
  0x86   :  { %v33_v6 = vpop.trf.xlu0 }
  0x87   :  { %v49_v7 = vand.u32 2147483647, %v33_v6  ;;  %vm61_vm2 = vcmp.lt.f32.partialorder %v33_v6, 0.0  ;;  %1062 = vlog2.f32 %v51_v5 }
  0x88   :  { %vm1020_vm3 = vmpackc.low %vm61_vm2, %vm60_vm1 }
  0x89   :  { %v52_v8 = vadd.f32 1e-12, %v49_v7  ;;  %1021 = vmatpush3.bf16.msk.msra.mxu0 %vm1020_vm3, %v1127_v9  ;;  %v1133_v9 = vmov 1326507024  }
  0x8a   :  { %v34_v10 = vpop.trf.xlu0  ;;  %968 = vmatprep.subr.mxu0 %v1126_v2 }
  0x8b   :  { %1064 = vlog2.f32 %v52_v8  ;;  %v50_v11 = vand.u32 2147483647, %v34_v10  ;;  %vm62_vm5 = vcmp.lt.f32.partialorder %v34_v10, 0.0 }
  0x8c   :  { %v65_v13 = vsel %vm62_vm5, 3.1415927, %v1126_v2 }
  0x8d   :  { %v53_v14 = vadd.f32 1e-12, %v50_v11  ;;  %969 = vmatpush3.msk.msra.mxu0 %vm87_vm4, %v65_v13 }
  0x8e   :  { %971 = vmatmul.mubr.msk.f32.vlgmr.msra.gmra.mrb[0].mxu0 %vm71_vm6, %v66_v12  ;;  %1025 = vmatprep.subr.bf16.mxu0 %v1124_v1 }
  0x8f   :  { %1066 = vlog2.f32 %v53_v14  ;;  %973 = vmatprep.mubr.msk.f32.mxu0 %vm1125_vm0, %v1126_v2 }
  0x91   :  { %v1063_v16 = vpop.eup %1062 }
  0x92   :  { %974 = vmatmul.mubr.msk.f32.gmra.mrb[2].mxu0 %vm71_vm6, %v67_v15  ;;  %v55_v19 = vmul.f32 0.6931472, %v1063_v16 }
  0x93   :  { %976 = vmatprep.mubr.msk.f32.mxu0 %vm1125_vm0, %v1126_v2 }
  0x95   :  { %v1065_v18 = vpop.eup %1064 }
  0x96   :  { %977 = vmatmul.mubr.msk.f32.gmra.mrb[4].mxu0 %vm71_vm6, %v68_v17  ;;  %v57_v20 = vmul.f32 0.6931472, %v1065_v18 }
  0x97   :  { %979 = vmatprep.mubr.msk.f32.mxu0 %vm1125_vm0, %v1126_v2 }
  0x98   :  { %v1023_v22 = vpack.c.bf16 %v57_v20, %v55_v19 }
  0x99   :  { %v1067_v23 = vpop.eup %1066 }
  0x9a   :  { %980 = vmatmul.mubr.msk.f32.gmra.mrb[6].mxu0 %vm71_vm6, %v69_v21  ;;  %1024 = vmatpush3.bf16.msra.mxu1 %v1023_v22  ;;  %v59_v25 = vmul.f32 0.6931472, %v1067_v23 }
  0x9b   :  { %982 = vmatprep.mubr.msk.f32.mxu0 %vm1125_vm0, %v1126_v2  ;;  %989 = vmatprep.subr.mxu1 %v1126_v2 }
  0x9e   :  { %983 = vmatmul.mubr.msk.f32.gmra.mrb[8].mxu0 %vm71_vm6, %v70_v24  ;;  %990 = vmatpush3.msk.msra.mxu1 %vm87_vm4, %v59_v25 }
  0x9f   :  { %992 = vmatmul.mubr.msk.f32.vlgmr.msra.gmra.mrb[0].mxu1 %vm71_vm6, %v66_v12  ;;  %1016 = vmatprep.mubr.msk.f32.mxu0 %vm1125_vm0, %v1126_v2 }
  0xa0   :  { %994 = vmatprep.mubr.msk.f32.mxu1 %vm1125_vm0, %v1126_v2 }
  0xa3   :  { %995 = vmatmul.mubr.msk.f32.gmra.mrb[2].mxu1 %vm71_vm6, %v67_v15 }
  0xa4   :  { %997 = vmatprep.mubr.msk.f32.mxu1 %vm1125_vm0, %v1126_v2 }
  0xa7   :  { %998 = vmatmul.mubr.msk.f32.gmra.mrb[4].mxu1 %vm71_vm6, %v68_v17 }
  0xa8   :  { %1000 = vmatprep.mubr.msk.f32.mxu1 %vm1125_vm0, %v1126_v2 }
  0xab   :  { %1001 = vmatmul.mubr.msk.f32.gmra.mrb[6].mxu1 %vm71_vm6, %v69_v21 }
  0xac   :  { %1003 = vmatprep.mubr.msk.f32.mxu1 %vm1125_vm0, %v1126_v2 }
  0xaf   :  { %1004 = vmatmul.mubr.msk.f32.gmra.mrb[8].mxu1 %vm71_vm6, %v70_v24 }
 0x161   :  { %v1213_v26 = vpop.f32.mrb[0].mxu0 }
 0x162   :  { %v181_v27 = vand.u32 2147483647, %v1213_v26  ;;  %v184_v28 = vand.u32 2139095040, %v1213_v26  ;;  %v972_v29 = vpop.f32.mrb[1].mxu0  ;;  %vm183_vm4 = vcmp.lt.s32.totalorder %v1213_v26, 0 }
 0x164   :  { %v185_v30 = vshrl.u32 %v184_v28, 23  ;;  %v188_v31 = vand.u32 8388607, %v181_v27 }
 0x165   :  { %v1219_v32 = vpop.f32.mrb[2].mxu0 }
 0x166   :  { %v915_v33 = vadd.s32 4294967169, %v185_v30  ;;  %v284_v34 = vand.u32 2147483647, %v1219_v32  ;;  %v975_v35 = vpop.f32.mrb[3].mxu0  ;;  %v287_v36 = vand.u32 2139095040, %v1219_v32  ;;  %v189_v38 = vor.u32 8388608, %v188_v31 }
 0x168   :  { %v191_v37 = vadd.s32 1, %v915_v33  ;;  %v288_v39 = vshrl.u32 %v287_v36, 23  ;;  %v1225_v40 = vand.u32 8388607, %v284_v34  ;;  %v1230_v48 = vshll.u32 %v189_v38, 8 }
 0x169   :  { %v1227_v41 = vpop.f32.mrb[4].mxu0 }
 0x16a   :  { %vm192_vm7 = vcmp.gt.s32.totalorder %v191_v37, 0  ;;  %v978_v42 = vpop.f32.mrb[5].mxu0  ;;  %v919_v44 = vadd.s32 4294967169, %v288_v39  ;;  %v390_v45 = vand.u32 2139095040, %v1227_v41  ;;  %v292_v49 = vor.u32 8388608, %v1225_v40 }
 0x16b   :  { %v193_v43 = vsel %vm192_vm7, %v191_v37, 0  ;;  %v387_v51 = vand.u32 2147483647, %v1227_v41 }
 0x16c   :  { %v194_v46 = vshrl.u32 %v193_v43, 5  ;;  %v195_v47 = vand.u32 31, %v193_v43  ;;  %v294_v50 = vadd.s32 1, %v919_v44  ;;  %v391_v58 = vshrl.u32 %v390_v45, 23 }
 0x16d   :  { %v1234_v52 = vpop.f32.mrb[6].mxu0  ;;  %v1264_v40 = vshll.u32 %v292_v49, 8 }
 0x16e   :  { %v196_v53 = vsub.s32 32, %v195_v47  ;;  %v198_v55 = vshll.u32 %v1128_v54, %v195_v47  ;;  %v201_v57 = vshll.u32 %v1129_v56, %v195_v47  ;;  %v981_v59 = vpop.f32.mrb[7].mxu0  ;;  %v204_v61 = vshll.u32 %v1130_v60, %v195_v47 }
 0x16f   :  { %v207_v63 = vshll.u32 %v1131_v62, %v195_v47  ;;  %v210_v3 = vshll.u32 %v1132_v0, %v195_v47  ;;  %vm213_vm8 = vcmp.lt.s32.totalorder %v194_v46, 1  ;;  %vm214_vm9 = vcmp.lt.s32.totalorder %v194_v46, 2 }
 0x170   :  { %v199_v4 = vshrl.u32 %v1129_v56, %v196_v53  ;;  %v202_v5 = vshrl.u32 %v1130_v60, %v196_v53  ;;  %v205_v6 = vshrl.u32 %v1131_v62, %v196_v53  ;;  %v197_v7 = vshrl.u32 %v1128_v54, %v196_v53 }
 0x171   :  { %v208_v8 = vshrl.u32 %v1132_v0, %v196_v53  ;;  %v211_v10 = vshrl.u32 %v1133_v9, %v196_v53  ;;  %vm215_vm10 = vcmp.lt.s32.totalorder %v194_v46, 3  ;;  %v1247_v11 = vpop.f32.mrb[8].mxu0  ;;  %vm295_vm11 = vcmp.gt.s32.totalorder %v294_v50, 0 }
 0x172   :  { %v200_v12 = vor.u32 %v199_v4, %v198_v55  ;;  %v203_v13 = vor.u32 %v202_v5, %v201_v57  ;;  %v206_v14 = vor.u32 %v205_v6, %v204_v61  ;;  %v984_v15 = vpop.f32.mrb[9].mxu0  ;;  %vm216_vm12 = vcmp.lt.s32.totalorder %v194_v46, 4  ;;  %v1252_v23 = vpop.f32.mrb[0].mxu1 }
 0x173   :  { %v209_v16 = vor.u32 %v208_v8, %v207_v63  ;;  %v212_v17 = vor.u32 %v211_v10, %v210_v3  ;;  %v296_v18 = vsel %vm295_vm11, %v294_v50, 0  ;;  %v993_v30 = vpop.f32.mrb[1].mxu1  ;;  %v923_v55 = vadd.s32 4294967169, %v391_v58 }
 0x174   :  { %v217_v19 = vsel %vm213_vm8, %v197_v7, %v200_v12  ;;  %v218_v20 = vsel %vm216_vm12, %v206_v14, 2102212464  ;;  %v221_v21 = vsel %vm213_vm8, %v200_v12, %v203_v13  ;;  %v225_v22 = vsel %vm213_vm8, %v203_v13, %v206_v14 }
 0x175   :  { %v219_v24 = vsel %vm215_vm10, %v203_v13, %v218_v20  ;;  %v222_v25 = vsel %vm216_vm12, %v209_v16, 920167782  ;;  %v226_v28 = vsel %vm216_vm12, %v212_v17, 1326507024  ;;  %v1255_v29 = vshrl.u32 %v296_v18, 5 }
 0x176   :  { %v220_v31 = vsel %vm214_vm9, %v217_v19, %v219_v24  ;;  %v223_v33 = vsel %vm215_vm10, %v206_v14, %v222_v25  ;;  %v227_v35 = vsel %vm215_vm10, %v209_v16, %v226_v28  ;;  %v298_v36 = vand.u32 31, %v296_v18  ;;  %v1260_v37 = vpop.f32.mrb[2].mxu1 }
 0x177   :  { %v224_v38 = vsel %vm214_vm9, %v221_v21, %v223_v33  ;;  %v228_v39 = vsel %vm214_vm9, %v225_v22, %v227_v35  ;;  %v996_v42 = vpop.f32.mrb[3].mxu1  ;;  %v236_v50 = vmul.u32 %v1230_v48, %v220_v31  ;;  %v1278_v46 = vand.u32 8388607, %v387_v51 }
 0x178   :  { %v1267_v43 = vmul.u32.u64.low %v1230_v48, %v228_v39  ;;  %v1268_v44 = vmul.u32.u64.high %v1230_v48, %v228_v39, %v1267_v43  ;;  %v1271_v45 = vmul.u32.u64.low %v1230_v48, %v224_v38  ;;  %v1272_v47 = vmul.u32.u64.high %v1230_v48, %v224_v38, %v1271_v45 }
 0x179   :  { %v299_v53 = vsub.s32 32, %v298_v36  ;;  %v301_v49 = vshll.u32 %v1128_v54, %v298_v36  ;;  %v304_v57 = vshll.u32 %v1129_v56, %v298_v36  ;;  %v307_v59 = vshll.u32 %v1130_v60, %v298_v36 }
 0x17a   :  { %vm316_vm13 = vcmp.lt.s32.totalorder %v1255_v29, 1  ;;  %v1284_v61 = vpop.f32.mrb[4].mxu1  ;;  %v310_v3 = vshll.u32 %v1131_v62, %v298_v36  ;;  %vm238_vm14 = vc.u32 %v1268_v44, %v1271_v45  ;;  %v239_v5 = vadd.s32 1, %v1272_v47 }
 0x17b   :  { %v302_v63 = vshrl.u32 %v1129_v56, %v299_v53  ;;  %v305_v48 = vshrl.u32 %v1130_v60, %v299_v53  ;;  %v308_v58 = vshrl.u32 %v1131_v62, %v299_v53  ;;  %v999_v4 = vpop.f32.mrb[5].mxu1  ;;  %v311_v6 = vshrl.u32 %v1132_v0, %v299_v53 }
 0x17c   :  { %v313_v7 = vshll.u32 %v1132_v0, %v298_v36  ;;  %v314_v13 = vshrl.u32 %v1133_v9, %v299_v53  ;;  %v240_v14 = vsel %vm238_vm14, %v239_v5, %v1272_v47  ;;  %vm317_vm15 = vcmp.lt.s32.totalorder %v1255_v29, 2 }
 0x17d   :  { %v303_v8 = vor.u32 %v302_v63, %v301_v49  ;;  %v306_v10 = vor.u32 %v305_v48, %v304_v57  ;;  %v309_v12 = vor.u32 %v308_v58, %v307_v59  ;;  %v312_v15 = vor.u32 %v311_v6, %v310_v3 }
 0x17e   :  { %vm319_vm0 = vcmp.lt.s32.totalorder %v1255_v29, 4  ;;  %v1299_v16 = vpop.f32.mrb[6].mxu1  ;;  %v241_v17 = vadd.s32 %v240_v14, %v236_v50  ;;  %v300_v18 = vshrl.u32 %v1128_v54, %v299_v53  ;;  %v315_v19 = vor.u32 %v314_v13, %v313_v7 }
 0x17f   :  { %v321_v20 = vsel %vm319_vm0, %v309_v12, 2102212464  ;;  %v1002_v21 = vpop.f32.mrb[7].mxu1  ;;  %vm318_vm1 = vcmp.lt.s32.totalorder %v1255_v29, 3  ;;  %v324_v22 = vsel %vm316_vm13, %v303_v8, %v306_v10  ;;  %v325_v24 = vsel %vm319_vm0, %v312_v15, 920167782 }
 0x180   :  { %v328_v25 = vsel %vm316_vm13, %v306_v10, %v309_v12  ;;  %v242_v28 = vadd.s32 536870912, %v241_v17  ;;  %v320_v30 = vsel %vm316_vm13, %v300_v18, %v303_v8  ;;  %v326_v31 = vsel %vm318_vm1, %v309_v12, %v325_v24 }
 0x181   :  { %v329_v33 = vsel %vm319_vm0, %v315_v19, 1326507024  ;;  %v322_v35 = vsel %vm318_vm1, %v306_v10, %v321_v20  ;;  %v327_v36 = vsel %vm317_vm15, %v324_v22, %v326_v31  ;;  %v397_v39 = vadd.s32 1, %v923_v55 }
 0x182   :  { %v330_v38 = vsel %vm318_vm1, %v312_v15, %v329_v33  ;;  %v1311_v42 = vshrl.u32 %v242_v28, 30  ;;  %v1316_v47 = vmul.u32.u64.low %v1264_v40, %v327_v36  ;;  %v1317_v50 = vmul.u32.u64.high %v1264_v40, %v327_v36, %v1316_v47 }
 0x183   :  { %v331_v43 = vsel %vm317_vm15, %v328_v25, %v330_v38  ;;  %vm398_vm2 = vcmp.gt.s32.totalorder %v397_v39, 0  ;;  %v323_v55 = vsel %vm317_vm15, %v320_v30, %v322_v35  ;;  %v395_v59 = vor.u32 8388608, %v1278_v46 }
 0x184   :  { %v1321_v53 = vmul.u32.u64.low %v1264_v40, %v331_v43  ;;  %v1322_v49 = vmul.u32.u64.high %v1264_v40, %v331_v43, %v1321_v53  ;;  %v244_v57 = vshll.u32 %v1311_v42, 30  ;;  %v399_v63 = vsel %vm398_vm2, %v397_v39, 0 }
 0x185   :  { %v401_v48 = vand.u32 31, %v399_v63  ;;  %v342_v3 = vadd.s32 1, %v1317_v50  ;;  %v339_v4 = vmul.u32 %v1264_v40, %v323_v55  ;;  %v237_v6 = vadd.s32 %v1271_v45, %v1268_v44 }
 0x186   :  { %v1328_v58 = vsub.s32 %v241_v17, %v244_v57  ;;  %vm341_vm3 = vc.u32 %v1322_v49, %v1316_v47  ;;  %v1338_v46 = vshll.u32 %v395_v59, 8  ;;  %v1340_v10 = vshrl.u32 %v399_v63, 5 }
 0x187   :  { %v402_v5 = vsub.s32 32, %v401_v48  ;;  %v343_v7 = vsel %vm341_vm3, %v342_v3, %v1317_v50  ;;  %v404_v12 = vshll.u32 %v1128_v54, %v401_v48  ;;  %v410_v15 = vshll.u32 %v1130_v60, %v401_v48 }
 0x188   :  { %v247_v29 = vsub.s32 0, %v1328_v58  ;;  %v344_v8 = vadd.s32 %v343_v7, %v339_v4  ;;  %v407_v17 = vshll.u32 %v1129_v56, %v401_v48  ;;  %v413_v18 = vshll.u32 %v1131_v62, %v401_v48 }
 0x189   :  { %v405_v40 = vshrl.u32 %v1129_v56, %v402_v5  ;;  %v408_v14 = vshrl.u32 %v1130_v60, %v402_v5  ;;  %v411_v44 = vshrl.u32 %v1131_v62, %v402_v5  ;;  %v414_v19 = vshrl.u32 %v1132_v0, %v402_v5 }
 0x18a   :  { %v916_v13 = vmin.u32 %v247_v29, %v1328_v58  ;;  %v345_v45 = vadd.s32 536870912, %v344_v8  ;;  %v267_v21 = vsub.s32 4, %v1311_v42  ;;  %v417_v31 = vshrl.u32 %v1133_v9, %v402_v5  ;;  %v1378_v29 = vpop.f32.mrb[8].mxu1 }
 0x18b   :  { %v406_v22 = vor.u32 %v405_v40, %v404_v12  ;;  %v412_v24 = vor.u32 %v411_v44, %v410_v15  ;;  %v409_v28 = vor.u32 %v408_v14, %v407_v17  ;;  %v415_v30 = vor.u32 %v414_v19, %v413_v18  ;;  %v1005_v40 = vpop.f32.mrb[9].mxu1 }
 0x18c   :  { %v249_v20 = vclz %v916_v13  ;;  %v346_v25 = vshrl.u32 %v345_v45, 30  ;;  %v403_v35 = vshrl.u32 %v1128_v54, %v402_v5  ;;  %v490_v36 = vand.u32 2147483647, %v1234_v52 }
 0x18d   :  { %v493_v38 = vand.u32 2139095040, %v1234_v52  ;;  %v416_v43 = vshll.u32 %v1132_v0, %v401_v48  ;;  %vm419_vm5 = vcmp.lt.s32.totalorder %v1340_v10, 1  ;;  %vm422_vm6 = vcmp.lt.s32.totalorder %v1340_v10, 4 }
 0x18e   :  { %v917_v33 = vadd.s32 4294967294, %v249_v20  ;;  %v347_v39 = vshll.u32 %v346_v25, 30  ;;  %vm420_vm8 = vcmp.lt.s32.totalorder %v1340_v10, 2  ;;  %v424_v50 = vsel %vm422_vm6, %v412_v24, 2102212464 }
 0x18f   :  { %v428_v53 = vsel %vm422_vm6, %v415_v30, 920167782  ;;  %vm1367_vm9 = vcmp.le.f32.partialorder %v181_v27, 0.7853982  ;;  %v418_v63 = vor.u32 %v417_v31, %v416_v43  ;;  %v427_v48 = vsel %vm419_vm5, %v406_v22, %v409_v28 }
 0x190   :  { %vm918_vm7 = vcmp.lt.s32.totalorder %v917_v33, 0  ;;  %v1371_v59 = vsub.s32 %v344_v8, %v347_v39  ;;  %vm421_vm10 = vcmp.lt.s32.totalorder %v1340_v10, 3  ;;  %v423_v5 = vsel %vm419_vm5, %v403_v35, %v406_v22 }
 0x191   :  { %v252_v55 = vsel %vm918_vm7, 0, %v917_v33  ;;  %v425_v8 = vsel %vm421_vm10, %v409_v28, %v424_v50  ;;  %v429_v12 = vsel %vm421_vm10, %v412_v24, %v428_v53  ;;  %v431_v44 = vsel %vm419_vm5, %v409_v28, %v412_v24 }
 0x192   :  { %v253_v3 = vsub.s32 32, %v252_v55  ;;  %v257_v4 = vsub.s32 4294967266, %v252_v55  ;;  %v254_v27 = vshll.u32 %v1328_v58, %v252_v55  ;;  %v350_v7 = vsub.s32 0, %v1371_v59 }
 0x193   :  { %v430_v15 = vsel %vm420_vm8, %v427_v48, %v429_v12  ;;  %v432_v58 = vsel %vm422_vm6, %v418_v63, 1326507024  ;;  %v370_v24 = vsub.s32 4, %v346_v25  ;;  %v494_v33 = vshrl.u32 %v493_v38, 23 }
 0x194   :  { %v255_v13 = vshrl.u32 %v237_v6, %v253_v3  ;;  %v258_v14 = vadd.s32 127, %v257_v4  ;;  %v920_v45 = vmin.u32 %v350_v7, %v1371_v59  ;;  %v268_v6 = vsel %vm183_vm4, %v267_v21, %v1311_v42 }
 0x195   :  { %v1394_v17 = vmul.u32.u64.low %v1338_v46, %v430_v15  ;;  %v1395_v18 = vmul.u32.u64.high %v1338_v46, %v430_v15, %v1394_v17  ;;  %v433_v22 = vsel %vm421_vm10, %v415_v30, %v432_v58  ;;  %v426_v39 = vsel %vm420_vm8, %v423_v5, %v425_v8 }
 0x196   :  { %v256_v19 = vor.u32 %v255_v13, %v254_v27  ;;  %v259_v20 = vshll.u32 %v258_v14, 23  ;;  %v352_v31 = vclz %v920_v45  ;;  %v434_v28 = vsel %vm420_vm8, %v431_v44, %v433_v22 }
 0x197   :  { %v1407_v43 = vmul.u32.u64.low %v1338_v46, %v434_v28  ;;  %v1408_v50 = vmul.u32.u64.high %v1338_v46, %v434_v28, %v1407_v43  ;;  %v445_v42 = vadd.s32 1, %v1395_v18  ;;  %v927_v21 = vadd.s32 4294967169, %v494_v33 }
 0x198   :  { %v260_v35 = vor.u32 4788187, %v259_v20  ;;  %v921_v53 = vadd.s32 4294967294, %v352_v31  ;;  %v497_v30 = vand.u32 8388607, %v490_v36  ;;  %v263_v63 = vcvt.s32.f32 %v256_v19 }
 0x199   :  { %v270_v38 = vsel %vm1367_vm9, 0, %v268_v6  ;;  %vm286_vm11 = vcmp.lt.s32.totalorder %v1219_v32, 0  ;;  %v340_v10 = vadd.s32 %v1316_v47, %v1322_v49  ;;  %v500_v3 = vadd.s32 1, %v927_v21 }
 0x19a   :  { %v261_v55 = vand.u32 2147483647, %v260_v35  ;;  %vm922_vm12 = vcmp.lt.s32.totalorder %v921_v53, 0  ;;  %v1420_v48 = vsel %vm286_vm11, %v370_v24, %v346_v25  ;;  %v442_v27 = vmul.u32 %v1338_v46, %v426_v39 }
 0x19b   :  { %v355_v5 = vsel %vm922_vm12, 0, %v921_v53  ;;  %vm444_vm13 = vc.u32 %v1408_v50, %v1394_v17  ;;  %v498_v40 = vor.u32 8388608, %v497_v30  ;;  %vm501_vm14 = vcmp.gt.s32.totalorder %v500_v3, 0 }
 0x19c   :  { %v264_v4 = vmul.f32 %v263_v63, %v261_v55  ;;  %v356_v7 = vsub.s32 32, %v355_v5  ;;  %v360_v8 = vsub.s32 4294967266, %v355_v5  ;;  %v446_v12 = vsel %vm444_vm13, %v445_v42, %v1395_v18 }
 0x19d   :  { %v447_v14 = vadd.s32 %v446_v12, %v442_v27  ;;  %v596_v47 = vand.u32 2139095040, %v1247_v11  ;;  %v357_v49 = vshll.u32 %v1371_v59, %v355_v5  ;;  %v502_v44 = vsel %vm501_vm14, %v500_v3, 0 }
 0x19e   :  { %v265_v13 = vxor.u32 2147483648, %v264_v4  ;;  %v358_v25 = vshrl.u32 %v340_v10, %v356_v7  ;;  %v361_v15 = vadd.s32 127, %v360_v8  ;;  %v1427_v45 = vand.u32 3, %v270_v38 }
 0x19f   :  { %vm1431_vm15 = vcmp.le.f32.partialorder %v284_v34, 0.7853982  ;;  %v448_v58 = vadd.s32 536870912, %v447_v14  ;;  %v504_v18 = vand.u32 31, %v502_v44  ;;  %vm389_vm0 = vcmp.lt.s32.totalorder %v1227_v41, 0 }
 0x1a0   :  { %v266_v19 = vsel %vm183_vm4, %v265_v13, %v264_v4  ;;  %v359_v20 = vor.u32 %v358_v25, %v357_v49  ;;  %v362_v6 = vshll.u32 %v361_v15, 23  ;;  %v373_v59 = vsel %vm1431_vm15, 0, %v1420_v48 }
 0x1a1   :  { %v449_v22 = vshrl.u32 %v448_v58, 30  ;;  %v505_v31 = vsub.s32 32, %v504_v18  ;;  %v593_v34 = vand.u32 2147483647, %v1247_v11  ;;  %v597_v24 = vshrl.u32 %v596_v47, 23 }
 0x1a2   :  { %v363_v28 = vor.u32 4788187, %v362_v6  ;;  %v1443_v33 = vadd.s32 %v1394_v17, %v1408_v50  ;;  %v503_v35 = vshrl.u32 %v502_v44, 5  ;;  %v1445_v39 = vshll.u32 %v498_v40, 8 }
 0x1a3   :  { %v269_v43 = vsel %vm1367_vm9, %v1213_v26, %v266_v19  ;;  %v450_v53 = vshll.u32 %v449_v22, 30  ;;  %v507_v42 = vshll.u32 %v1128_v54, %v504_v18  ;;  %v508_v21 = vshrl.u32 %v1129_v56, %v505_v31 }
 0x1a4   :  { %v364_v30 = vand.u32 2147483647, %v363_v28  ;;  %v366_v55 = vcvt.s32.f32 %v359_v20  ;;  %v511_v63 = vshrl.u32 %v1130_v60, %v505_v31  ;;  %v514_v38 = vshrl.u32 %v1131_v62, %v505_v31 }
 0x1a5   :  { %v1454_v17 = vsub.s32 %v447_v14, %v450_v53  ;;  %v510_v50 = vshll.u32 %v1129_v56, %v504_v18  ;;  %v513_v10 = vshll.u32 %v1130_v60, %v504_v18  ;;  %v931_v3 = vadd.s32 4294967169, %v597_v24 }
 0x1a6   :  { %v367_v57 = vmul.f32 %v366_v55, %v364_v30  ;;  %v473_v4 = vsub.s32 4, %v449_v22  ;;  %v509_v5 = vor.u32 %v508_v21, %v507_v42  ;;  %v516_v27 = vshll.u32 %v1131_v62, %v504_v18 }
 0x1a7   :  { %vm1461_vm1 = vcmp.le.f32.partialorder %v387_v51, 0.7853982  ;;  %v453_v8 = vsub.s32 0, %v1454_v17  ;;  %v512_v12 = vor.u32 %v511_v63, %v510_v50  ;;  %v515_v40 = vor.u32 %v514_v38, %v513_v10 }
 0x1a8   :  { %v517_v13 = vshrl.u32 %v1132_v0, %v505_v31  ;;  %1068 = vcosq.f32 %v269_v43  ;;  %v368_v14 = vxor.u32 2147483648, %v367_v57  ;;  %v519_v47 = vshll.u32 %v1132_v0, %v504_v18 }
 0x1a9   :  { %v520_v49 = vshrl.u32 %v1133_v9, %v505_v31  ;;  %1070 = vsinq.f32 %v269_v43  ;;  %v924_v25 = vmin.u32 %v453_v8, %v1454_v17  ;;  %v506_v51 = vshrl.u32 %v1128_v54, %v505_v31 }
 0x1aa   :  { %v518_v15 = vor.u32 %v517_v13, %v516_v27  ;;  %v474_v44 = vsel %vm389_vm0, %v473_v4, %v449_v22  ;;  %vm522_vm2 = vcmp.lt.s32.totalorder %v503_v35, 1  ;;  %vm525_vm3 = vcmp.lt.s32.totalorder %v503_v35, 4 }
 0x1ab   :  { %v521_v58 = vor.u32 %v520_v49, %v519_v47  ;;  %v455_v19 = vclz %v924_v25  ;;  %vm523_vm4 = vcmp.lt.s32.totalorder %v503_v35, 2  ;;  %v527_v20 = vsel %vm525_vm3, %v515_v40, 2102212464 }
 0x1ac   :  { %v530_v6 = vsel %vm522_vm2, %v509_v5, %v512_v12  ;;  %v369_v18 = vsel %vm286_vm11, %v368_v14, %v367_v57  ;;  %vm524_vm5 = vcmp.lt.s32.totalorder %v503_v35, 3  ;;  %v531_v24 = vsel %vm525_vm3, %v518_v15, 920167782 }
 0x1ad   :  { %v534_v28 = vsel %vm522_vm2, %v512_v12, %v515_v40  ;;  %v925_v43 = vadd.s32 4294967294, %v455_v19  ;;  %v526_v53 = vsel %vm522_vm2, %v506_v51, %v509_v5  ;;  %v532_v31 = vsel %vm524_vm5, %v515_v40, %v531_v24 }
 0x1ae   :  { %v535_v42 = vsel %vm525_vm3, %v521_v58, 1326507024  ;;  %v528_v21 = vsel %vm524_vm5, %v512_v12, %v527_v20  ;;  %v533_v22 = vsel %vm523_vm4, %v530_v6, %v532_v31  ;;  %v600_v55 = vand.u32 8388607, %v593_v34 }
 0x1af   :  { %v536_v30 = vsel %vm524_vm5, %v518_v15, %v535_v42  ;;  %vm926_vm6 = vcmp.lt.s32.totalorder %v925_v43, 0  ;;  %v1480_v38 = vmul.u32.u64.low %v1445_v39, %v533_v22  ;;  %v1481_v50 = vmul.u32.u64.high %v1445_v39, %v533_v22, %v1480_v38 }
 0x1b0   :  { %v537_v63 = vsel %vm523_vm4, %v534_v28, %v536_v30  ;;  %v458_v10 = vsel %vm926_vm6, 0, %v925_v43  ;;  %v476_v57 = vsel %vm1461_vm1, 0, %v474_v44  ;;  %v529_v12 = vsel %vm523_vm4, %v526_v53, %v528_v21 }
 0x1b1   :  { %v1487_v4 = vmul.u32.u64.low %v1445_v39, %v537_v63  ;;  %v1488_v5 = vmul.u32.u64.high %v1445_v39, %v537_v63, %v1487_v4  ;;  %v459_v27 = vsub.s32 32, %v458_v10  ;;  %v463_v8 = vsub.s32 4294967266, %v458_v10 }
 0x1b2   :  { %v603_v40 = vadd.s32 1, %v931_v3  ;;  %v1491_v13 = vpop.eup %1068  ;;  %v372_v14 = vsel %vm1431_vm15, %v1219_v32, %v369_v18  ;;  %v1500_v47 = vand.u32 3, %v373_v59  ;;  %v460_v49 = vshll.u32 %v1454_v17, %v458_v10 }
 0x1b3   :  { %v601_v25 = vor.u32 8388608, %v600_v55  ;;  %v1503_v51 = vpop.eup %1070  ;;  %v461_v35 = vshrl.u32 %v1443_v33, %v459_v27  ;;  %v464_v3 = vadd.s32 127, %v463_v8  ;;  %v548_v15 = vadd.s32 1, %v1481_v50 }
 0x1b4   :  { %vm604_vm7 = vcmp.gt.s32.totalorder %v603_v40, 0  ;;  %v1507_v44 = vand.u32 3, %v476_v57  ;;  %v545_v58 = vmul.u32 %v1445_v39, %v529_v12  ;;  %vm547_vm8 = vc.u32 %v1488_v5, %v1480_v38 }
 0x1b5   :  { %v605_v48 = vsel %vm604_vm7, %v603_v40, 0  ;;  %1072 = vcosq.f32 %v372_v14  ;;  %v462_v46 = vor.u32 %v461_v35, %v460_v49  ;;  %v465_v59 = vshll.u32 %v464_v3, 23 }
 0x1b6   :  { %v549_v17 = vsel %vm547_vm8, %v548_v15, %v1481_v50  ;;  %1074 = vsinq.f32 %v372_v14  ;;  %v607_v33 = vand.u32 31, %v605_v48  ;;  %v1513_v20 = vshll.u32 %v601_v25, 8 }
 0x1b7   :  { %v550_v19 = vadd.s32 %v549_v17, %v545_v58  ;;  %v466_v6 = vor.u32 4788187, %v465_v59  ;;  %v1515_v18 = vshrl.u32 %v605_v48, 5  ;;  %vm276_vm9 = vcmp.eq.s32.totalorder %v1427_v45, 0 }
 0x1b8   :  { %v277_v39 = vxor.u32 2147483648, %v1503_v51  ;;  %v469_v24 = vcvt.s32.f32 %v462_v46  ;;  %v608_v43 = vsub.s32 32, %v607_v33  ;;  %v610_v53 = vshll.u32 %v1128_v54, %v607_v33 }
 0x1b9   :  { %v551_v28 = vadd.s32 536870912, %v550_v19  ;;  %v467_v31 = vand.u32 2147483647, %v466_v6  ;;  %v613_v42 = vshll.u32 %v1129_v56, %v607_v33  ;;  %v616_v21 = vshll.u32 %v1130_v60, %v607_v33 }
 0x1ba   :  { %v619_v22 = vshll.u32 %v1131_v62, %v607_v33  ;;  %v611_v55 = vshrl.u32 %v1129_v56, %v608_v43  ;;  %v614_v63 = vshrl.u32 %v1130_v60, %v608_v43  ;;  %v622_v50 = vshll.u32 %v1132_v0, %v607_v33 }
 0x1bb   :  { %v1523_v30 = vshrl.u32 %v551_v28, 30  ;;  %v470_v10 = vmul.f32 %v469_v24, %v467_v31  ;;  %v617_v57 = vshrl.u32 %v1131_v62, %v608_v43  ;;  %v620_v4 = vshrl.u32 %v1132_v0, %v608_v43 }
 0x1bc   :  { %v623_v27 = vshrl.u32 %v1133_v9, %v608_v43  ;;  %v609_v12 = vshrl.u32 %v1128_v54, %v608_v43  ;;  %v612_v40 = vor.u32 %v611_v55, %v610_v53  ;;  %vm275_vm10 = vcmp.lt.s32.totalorder %v1427_v45, 2 }
 0x1bd   :  { %v553_v8 = vshll.u32 %v1523_v30, 30  ;;  %vm279_vm11 = vcmp.eq.s32.totalorder %v1427_v45, 2  ;;  %v471_v56 = vxor.u32 2147483648, %v470_v10  ;;  %v615_v60 = vor.u32 %v614_v63, %v613_v42 }
 0x1be   :  { %v618_v14 = vor.u32 %v617_v57, %v616_v21  ;;  %v621_v49 = vor.u32 %v620_v4, %v619_v22  ;;  %vm273_vm12 = vweird.f32 %v1213_v26  ;;  %vm625_vm13 = vcmp.lt.s32.totalorder %v1515_v18, 1 }
 0x1bf   :  { %v1536_v62 = vsub.s32 %v550_v19, %v553_v8  ;;  %v278_v0 = vsel %vm276_vm9, %v1491_v13, %v277_v39  ;;  %v280_v54 = vxor.u32 2147483648, %v1491_v13  ;;  %v1073_v9 = vpop.eup %1072  ;;  %v472_v25 = vsel %vm389_vm0, %v471_v56, %v470_v10 }
 0x1c0   :  { %v624_v35 = vor.u32 %v623_v27, %v622_v50  ;;  %vm626_vm14 = vcmp.lt.s32.totalorder %v1515_v18, 2  ;;  %vm628_vm15 = vcmp.lt.s32.totalorder %v1515_v18, 4  ;;  %v1075_v3 = vpop.eup %1074  ;;  %v475_v15 = vsel %vm1461_vm1, %v1227_v41, %v472_v25 }
 0x1c1   :  { %v556_v58 = vsub.s32 0, %v1536_v62  ;;  %vm627_vm2 = vcmp.lt.s32.totalorder %v1515_v18, 3  ;;  %v630_v13 = vsel %vm628_vm15, %v618_v14, 2102212464  ;;  %1076 = vcosq.f32 %v475_v15 }
 0x1c2   :  { %v629_v48 = vsel %vm625_vm13, %v609_v12, %v612_v40  ;;  %v633_v46 = vsel %vm625_vm13, %v612_v40, %v615_v60  ;;  %v634_v59 = vsel %vm628_vm15, %v621_v49, 920167782  ;;  %1078 = vsinq.f32 %v475_v15 }
 0x1c3   :  { %v928_v7 = vmin.u32 %v556_v58, %v1536_v62  ;;  %v635_v17 = vsel %vm627_vm2, %v618_v14, %v634_v59  ;;  %v637_v19 = vsel %vm625_vm13, %v615_v60, %v618_v14  ;;  %v631_v33 = vsel %vm627_vm2, %v615_v60, %v630_v13 }
 0x1c4   :  { %v636_v6 = vsel %vm626_vm14, %v633_v46, %v635_v17  ;;  %v638_v39 = vsel %vm628_vm15, %v624_v35, 1326507024  ;;  %v281_v24 = vsel %vm279_vm11, %v280_v54, %v1503_v51  ;;  %vm376_vm0 = vweird.f32 %v1219_v32 }
 0x1c5   :  { %v558_v28 = vclz %v928_v7  ;;  %v639_v43 = vsel %vm627_vm2, %v621_v49, %v638_v39  ;;  %v1578_v53 = vmul.u32.u64.low %v1513_v20, %v636_v6  ;;  %v1579_v31 = vmul.u32.u64.high %v1513_v20, %v636_v6, %v1578_v53 }
 0x1c6   :  { %v546_v42 = vadd.s32 %v1480_v38, %v1488_v5  ;;  %v640_v21 = vsel %vm626_vm14, %v637_v19, %v639_v43  ;;  %v282_v51 = vsel %vm275_vm10, %v278_v0, %v281_v24  ;;  %v380_v22 = vxor.u32 2147483648, %v1075_v3 }
 0x1c7   :  { %v929_v55 = vadd.s32 4294967294, %v558_v28  ;;  %v1589_v63 = vmul.u32.u64.low %v1513_v20, %v640_v21  ;;  %v1590_v50 = vmul.u32.u64.high %v1513_v20, %v640_v21, %v1589_v63  ;;  %v283_v10 = vsel %vm273_vm12, nan, %v282_v51 }
 0x1c8   :  { %v632_v57 = vsel %vm626_vm14, %v629_v48, %v631_v33  ;;  %v696_v4 = vmax.f32 %v283_v10, 0.0  ;;  %vm379_vm1 = vcmp.eq.s32.totalorder %v1500_v47, 0  ;;  %v383_v38 = vxor.u32 2147483648, %v1073_v9 }
 0x1c9   :  { %vm930_vm3 = vcmp.lt.s32.totalorder %v929_v55, 0  ;;  %v651_v45 = vadd.s32 1, %v1579_v31  ;;  %v381_v5 = vsel %vm379_vm1, %v1073_v9, %v380_v22  ;;  %vm382_vm4 = vcmp.eq.s32.totalorder %v1500_v47, 2 }
 0x1ca   :  { %v561_v27 = vsel %vm930_vm3, 0, %v929_v55  ;;  %v701_v8 = vadd.f32 1e-30, %v696_v4  ;;  %vm378_vm5 = vcmp.lt.s32.totalorder %v1500_v47, 2  ;;  %v384_v12 = vsel %vm382_vm4, %v383_v38, %v1075_v3 }
 0x1cb   :  { %v562_v26 = vsub.s32 32, %v561_v27  ;;  %v566_v40 = vsub.s32 4294967266, %v561_v27  ;;  %v648_v18 = vmul.u32 %v1513_v20, %v632_v57  ;;  %vm481_vm6 = vcmp.lt.s32.totalorder %v1507_v44, 2  ;;  %v1077_v56 = vpop.eup %1076 }
 0x1cc   :  { %v563_v60 = vshll.u32 %v1536_v62, %v561_v27  ;;  %vm650_vm7 = vc.u32 %v1590_v50, %v1578_v53  ;;  %1080 = vlog2.f32 %v701_v8  ;;  %v385_v14 = vsel %vm378_vm5, %v381_v5, %v384_v12  ;;  %v1079_v49 = vpop.eup %1078 }
 0x1cd   :  { %v564_v0 = vshrl.u32 %v546_v42, %v562_v26  ;;  %v567_v54 = vadd.s32 127, %v566_v40  ;;  %v652_v47 = vsel %vm650_vm7, %v651_v45, %v1579_v31  ;;  %v386_v9 = vsel %vm376_vm0, nan, %v385_v14 }
 0x1ce   :  { %v653_v25 = vadd.s32 %v652_v47, %v648_v18  ;;  %v697_v20 = vmax.f32 %v386_v9, 0.0  ;;  %v483_v35 = vxor.u32 2147483648, %v1079_v49  ;;  %v486_v3 = vxor.u32 2147483648, %v1077_v56 }
 0x1cf   :  { %v565_v15 = vor.u32 %v564_v0, %v563_v60  ;;  %v568_v58 = vshll.u32 %v567_v54, 23  ;;  %vm482_vm8 = vcmp.eq.s32.totalorder %v1507_v44, 0  ;;  %vm485_vm9 = vcmp.eq.s32.totalorder %v1507_v44, 2 }
 0x1d0   :  { %v654_v62 = vadd.s32 536870912, %v653_v25  ;;  %v702_v13 = vadd.f32 1e-30, %v697_v20  ;;  %v484_v48 = vsel %vm482_vm8, %v1077_v56, %v483_v35  ;;  %v487_v46 = vsel %vm485_vm9, %v486_v3, %v1079_v49 }
 0x1d1   :  { %v569_v59 = vor.u32 4788187, %v568_v58  ;;  %vm479_vm10 = vweird.f32 %v1227_v41  ;;  %v488_v32 = vsel %vm481_vm6, %v484_v48, %v487_v46  ;;  %v572_v33 = vcvt.s32.f32 %v565_v15 }
 0x1d2   :  { %v1613_v7 = vshrl.u32 %v654_v62, 30  ;;  %1082 = vlog2.f32 %v702_v13  ;;  %v489_v17 = vsel %vm479_vm10, nan, %v488_v32  ;;  %vm492_vm11 = vcmp.lt.s32.totalorder %v1234_v52, 0 }
 0x1d3   :  { %v570_v19 = vand.u32 2147483647, %v569_v59  ;;  %v698_v6 = vmax.f32 %v489_v17, 0.0  ;;  %vm1619_vm12 = vcmp.le.f32.partialorder %v490_v36, 0.7853982  ;;  %v576_v22 = vsub.s32 4, %v1523_v30 }
 0x1d4   :  { %v656_v39 = vshll.u32 %v1613_v7, 30  ;;  %v649_v40 = vadd.s32 %v1578_v53, %v1590_v50  ;;  %vm582_vm0 = vweird.f32 %v1234_v52  ;;  %vm595_vm1 = vcmp.lt.s32.totalorder %v1247_v11, 0 }
 0x1d5   :  { %v573_v24 = vmul.f32 %v572_v33, %v570_v19  ;;  %v703_v28 = vadd.f32 1e-30, %v698_v6  ;;  %v577_v38 = vsel %vm492_vm11, %v576_v22, %v1523_v30  ;;  %vm594_vm3 = vcmp.le.f32.partialorder %v593_v34, 0.7853982 }
 0x1d6   :  { %v1081_v43 = vpop.eup %1080  ;;  %v657_v31 = vsub.s32 %v653_v25, %v656_v39  ;;  %v579_v27 = vsel %vm1619_vm12, 0, %v577_v38  ;;  %v679_v17 = vsub.s32 4, %v1613_v7  ;;  %vm685_vm7 = vweird.f32 %v1247_v11 }
 0x1d7   :  { %v574_v42 = vxor.u32 2147483648, %v573_v24  ;;  %v707_v21 = vmul.f32 0.6931472, %v1081_v43  ;;  %1084 = vlog2.f32 %v703_v28  ;;  %v583_v14 = vand.u32 3, %v579_v27 }
 0x1d8   :  { %v659_v41 = vsub.s32 0, %v657_v31  ;;  %vm815_vm8 = vcmask 326656   ;;  %vm891_vm9 = vcmask 57344  }
 0x1d9   :  { %v575_v51 = vsel %vm492_vm11, %v574_v42, %v573_v24  ;;  %v786_v55 = vadd.f32 %v1252_v23, %v707_v21  ;;  %vm588_vm14 = vcmp.eq.s32.totalorder %v583_v14, 2  ;;  %vm585_vm15 = vcmp.eq.s32.totalorder %v583_v14, 0 }
 0x1da   :  { %v578_v63 = vsel %vm1619_vm12, %v1234_v52, %v575_v51  ;;  %v932_v10 = vmin.u32 %v659_v41, %v657_v31  ;;  %vm584_vm2 = vcmp.lt.s32.totalorder %v583_v14, 2  ;;  %v680_v52 = vsel %vm595_vm1, %v679_v17, %v1613_v7 }
 0x1db   :  { %1086 = vcosq.f32 %v578_v63  ;;  %v809_v12 = vmax.f32 %v786_v55, -27.631021  ;;  %v682_v33 = vsel %vm594_vm3, 0, %v680_v52 }
 0x1dc   :  { %v1083_v57 = vpop.eup %1082  ;;  %1088 = vsinq.f32 %v578_v63  ;;  %v661_v4 = vclz %v932_v10  ;;  %v686_v39 = vand.u32 3, %v682_v33 }
 0x1dd   :  { %v709_v36 = vmul.f32 0.6931472, %v1083_v57 }
 0x1de   :  { %v933_v45 = vadd.s32 4294967294, %v661_v4  ;;  %vm691_vm4 = vcmp.eq.s32.totalorder %v686_v39, 2  ;;  %vm688_vm5 = vcmp.eq.s32.totalorder %v686_v39, 0  ;;  %vm687_vm6 = vcmp.lt.s32.totalorder %v686_v39, 2 }
 0x1df   :  { %v791_v5 = vadd.f32 %v1260_v37, %v709_v36  ;;  %v814_v36 = vld [vmem:[%s1664_s2] sm:$0x1] }
 0x1e0   :  { %vm934_vm13 = vcmp.lt.s32.totalorder %v933_v45, 0 }
 0x1e1   :  { %v1085_v23 = vpop.eup %1084  ;;  %v664_v8 = vsel %vm934_vm13, 0, %v933_v45  ;;  %v810_v26 = vmax.f32 %v791_v5, -27.631021 }
 0x1e2   :  { %v665_v18 = vsub.s32 32, %v664_v8  ;;  %v669_v56 = vsub.s32 4294967266, %v664_v8  ;;  %v711_v60 = vmul.f32 0.6931472, %v1085_v23  ;;  %v666_v49 = vshll.u32 %v657_v31, %v664_v8 }
 0x1e3   :  { %v1026_v30 = vpack.c.bf16 %v810_v26, %v809_v12 }
 0x1e4   :  { %v667_v0 = vshrl.u32 %v649_v40, %v665_v18  ;;  %v670_v54 = vadd.s32 127, %v669_v56  ;;  %v796_v37 = vadd.f32 %v1284_v61, %v711_v60 }
 0x1e5   :  { %v1087_v47 = vpop.eup %1086  ;;  %1027 = vmatpush3.bf16.msra.mxu0 %v1026_v30 }
 0x1e6   :  { %v1089_v9 = vpop.eup %1088  ;;  %v668_v25 = vor.u32 %v667_v0, %v666_v49  ;;  %v671_v20 = vshll.u32 %v670_v54, 23  ;;  %v589_v35 = vxor.u32 2147483648, %v1087_v47  ;;  %1028 = vmatprep.subr.bf16.mxu0 %v1124_v1  ;;  %v811_v21 = vmax.f32 %v796_v37, -27.631021 }
 0x1e7   :  { %v586_v3 = vxor.u32 2147483648, %v1089_v9 }
 0x1e8   :  { %v672_v53 = vor.u32 4788187, %v671_v20  ;;  %v590_v50 = vsel %vm588_vm14, %v589_v35, %v1089_v9  ;;  %v675_v62 = vcvt.s32.f32 %v668_v25 }
 0x1e9   :  { %v587_v15 = vsel %vm585_vm15, %v1087_v47, %v586_v3 }
 0x1ea   :  { %v673_v58 = vand.u32 2147483647, %v672_v53  ;;  %v591_v61 = vsel %vm584_vm2, %v587_v15, %v590_v50 }
 0x1eb   :  { %v592_v13 = vsel %vm582_vm0, nan, %v591_v61 }
 0x1ec   :  { %v676_v48 = vmul.f32 %v675_v62, %v673_v58  ;;  %v699_v46 = vmax.f32 %v592_v13, 0.0 }
 0x1ee   :  { %v677_v59 = vxor.u32 2147483648, %v676_v48  ;;  %v704_v32 = vadd.f32 1e-30, %v699_v46 }
 0x1f0   :  { %v678_v1 = vsel %vm595_vm1, %v677_v59, %v676_v48  ;;  %1090 = vlog2.f32 %v704_v32 }
 0x1f1   :  { %v681_v19 = vsel %vm594_vm3, %v1247_v11, %v678_v1 }
 0x1f2   :  { %1092 = vcosq.f32 %v681_v19 }
 0x1f3   :  { %1094 = vsinq.f32 %v681_v19 }
 0x1fa   :  { %v1091_v6 = vpop.eup %1090 }
 0x1fb   :  { %v713_v24 = vmul.f32 0.6931472, %v1091_v6 }
 0x1fc   :  { %v1093_v28 = vpop.eup %1092 }
 0x1fd   :  { %v1095_v43 = vpop.eup %1094  ;;  %v801_v31 = vadd.f32 %v1299_v16, %v713_v24  ;;  %v692_v42 = vxor.u32 2147483648, %v1093_v28 }
 0x1fe   :  { %v689_v34 = vxor.u32 2147483648, %v1095_v43 }
 0x1ff   :  { %v812_v41 = vmax.f32 %v801_v31, -27.631021  ;;  %v693_v44 = vsel %vm691_vm4, %v692_v42, %v1095_v43 }
 0x200   :  { %v690_v51 = vsel %vm688_vm5, %v1093_v28, %v689_v34 }
 0x201   :  { %v1029_v22 = vpack.c.bf16 %v812_v41, %v811_v21  ;;  %v694_v7 = vsel %vm687_vm6, %v690_v51, %v693_v44 }
 0x202   :  { %v695_v55 = vsel %vm685_vm7, nan, %v694_v7 }
 0x203   :  { %v700_v63 = vmax.f32 %v695_v55, 0.0  ;;  %1030 = vmatpush3.bf16.msra.mxu0 %v1029_v22 }
 0x204   :  { %1014 = vmatprep.subr.mxu0 %v1126_v2 }
 0x205   :  { %v705_v10 = vadd.f32 1e-30, %v700_v63 }
 0x207   :  { %1096 = vlog2.f32 %v705_v10 }
 0x211   :  { %v1097_v16 = vpop.eup %1096 }
 0x212   :  { %v715_v57 = vmul.f32 0.6931472, %v1097_v16 }
 0x214   :  { %v806_v4 = vadd.f32 %v1378_v29, %v715_v57 }
 0x216   :  { %v813_v38 = vmax.f32 %v806_v4, -27.631021 }
 0x218   :  { %1015 = vmatpush3.msra.mxu0 %v813_v38 }
 0x219   :  { %1017 = vmatmul.mubr.msk.f32.vlgmr.msra.gmra.mrb[10].mxu0 %vm815_vm8, %v814_v36 }
 0x2ec   :  { %v885_v11 = vpop.f32.mrb[10].mxu0 }
 0x2ed   :  { %v889_v45 = vmul.f32 1.442695, %v885_v11  ;;  %v1018_v5 = vpop.f32.mrb[11].mxu0 }
 0x2ef   :  { %1098 = vpow2.f32 %v889_v45 }
 0x2f9   :  { %v1099_v2 = vpop.eup %1098 }
 0x2fa   :  { %892 = vst.msk [vmem:[#allocation2] sm:$0x1] %vm891_vm9, %v1099_v2 }
 0x2fb   :  { %1111 = shalt.err (!%p1108_p4)
}
 0x2fc   :  { %s1112_s29 = scalar_lea.hbm %s1665_s3, 16 }
 0x2fd   :  { %p1113_p5 = scmp.ne.s32.totalorder %s1665_s3, %s1112_s29  ;;  %p1116_p6 = scmp.lt.u32.totalorder %s1112_s29, %s1665_s3 }
 0x2ff   :  { %p1118_p7 = pnand %p1116_p6, %p1113_p5 }
 0x301   :  { %1121 = shalt.err (!%p1118_p7)
}
 0x302   :  { %902 = dma.vmem_to_hbm [thread:$0]  %s900_s25, 16, %s1665_s3, [#allocation3]  }
 0x303   :  { %1122 = dma.done.wait [#allocation3], 16  }
 0x304   :  { %1123 = vsyncadd [#allocation3], 4294967280 }
 0x305   :  { %906 = vsyncpa [#allocation3], 1 }

</bundles_post_ra>
